<compile_context>
chip_gen: v7x
topology: tpu7x:2x2x1
jax: 0.10.0
libtpu: 0.0.40
codegen_flags: <defaults>
</compile_context>

<pallas_src>
import math

import jax
import jax.numpy as jnp
from jax.experimental import pallas as pl
from jax.experimental.pallas import tpu as pltpu  # noqa: F401  (TPU backend; no TPU-specific params needed at these sizes)

# ---------------- model hyper-parameters (small, consistent with the module) ----
BATCH = 2
SEQ = 8
EMBED = 32
HEADS = 4
HEAD_DIM = EMBED // HEADS
FF_EXPANSION = 2
HIDDEN = FF_EXPANSION * EMBED
LN_EPS = 1e-5
NEG_INF = jnp.float32(-1e30)
# TODO(synk): nn.Dropout is identity in eval mode; dropout is intentionally omitted.


def _layernorm(x, gamma, beta):
    mu = jnp.mean(x, axis=-1, keepdims=True)
    var = jnp.mean((x - mu) ** 2, axis=-1, keepdims=True)
    return (x - mu) * jax.lax.rsqrt(var + LN_EPS) * gamma + beta


def transformer_block_kernel(qkv_ref, q2d_ref, mask_ref, wqkv_ref, wo_ref,
                             w1_ref, w2_ref, vec_ref, out_ref):
    # ---- single lane-dense QKV projection ---------------------------------
    # qkv_ref: (NS, 3E) bf16 = [query | key | value]; wqkv_ref: (3E, 3E) bf16
    # (block-diagonal per source and per head; 1/sqrt(E) folded into Q blocks).
    proj = jnp.dot(qkv_ref[...], wqkv_ref[...],
                   preferred_element_type=jnp.float32)            # (NS, 3E) f32

    mask = mask_ref[...]                                          # (NS, NS), shared by all heads

    # ---- per-head attention (head separation is inherent to the math) -----
    # NOTE: fully-masked rows would produce 0/0 here; the causal mask always
    # keeps the diagonal unmasked, matching the original module's usage.
    head_outs = []
    for h in range(HEADS):
        qh = proj[:, h * HEAD_DIM:(h + 1) * HEAD_DIM].astype(jnp.bfloat16)
        kh = proj[:, EMBED + h * HEAD_DIM:EMBED + (h + 1) * HEAD_DIM].astype(jnp.bfloat16)
        vh = proj[:, 2 * EMBED + h * HEAD_DIM:2 * EMBED + (h + 1) * HEAD_DIM].astype(jnp.bfloat16)

        # contraction on the last dim of BOTH operands -> no explicit K transpose
        s = jnp.einsum('qd,kd->qk', qh, kh,
                       preferred_element_type=jnp.float32) + mask  # (NS, NS) f32
        s = s - jnp.max(s, axis=-1, keepdims=True)
        p = jnp.exp(s)
        p = p * pl.reciprocal(jnp.sum(p, axis=-1, keepdims=True), approx=True)  # EUP

        head_outs.append(jnp.dot(p.astype(jnp.bfloat16), vh,
                                 preferred_element_type=jnp.float32))  # (NS, HD) f32

    # ---- fc_out fused with the head concat: ONE (NS,E)@(E,E) MXU contraction ----
    heads_cat = jnp.concatenate(head_outs, axis=-1).astype(jnp.bfloat16)   # (NS, E)
    att = jnp.dot(heads_cat, wo_ref[...], preferred_element_type=jnp.float32)

    # ---- unpack the packed bias / layernorm vectors (single small input) ----
    vecs = vec_ref[...]                                           # (8, HIDDEN) f32
    bo = vecs[0:1, :EMBED]
    b1 = vecs[1:2, :]
    b2 = vecs[2:3, :EMBED]
    g1, be1 = vecs[3:4, :EMBED], vecs[4:5, :EMBED]
    g2, be2 = vecs[5:6, :EMBED], vecs[6:7, :EMBED]

    # ---- residual + norm1, feed-forward, residual + norm2 (f32 VPU math) ----
    x = _layernorm(att + bo + q2d_ref[...], g1, be1)

    h1 = jnp.maximum(jnp.dot(x.astype(jnp.bfloat16), w1_ref[...],
                             preferred_element_type=jnp.float32) + b1, 0.0)
    ff = jnp.dot(h1.astype(jnp.bfloat16), w2_ref[...],
                 preferred_element_type=jnp.float32) + b2

    out_ref[...] = _layernorm(ff + x, g2, be2).astype(out_ref.dtype)


def prepare_params(params):
    """One-time weight prep (hoisted out of the forward path)."""
    (wv, wk, wq, wo, bo, w1, b1, w2, b2, g1, be1, g2, be2) = params
    inv_scale = 1.0 / math.sqrt(float(EMBED))
    eye_h = jnp.eye(HEADS, dtype=jnp.float32)

    def per_head_block(w):          # (HD,HD) -> (E,E) = I_H (x) w.T, (in, out) layout
        return jnp.kron(eye_h, w.T)

    # (3E, 3E) block-diagonal QKV weight; softmax scale folded into the Q blocks.
    w_qkv = jnp.zeros((3 * EMBED, 3 * EMBED), jnp.float32)
    w_qkv = w_qkv.at[0:EMBED, 0:EMBED].set(per_head_block(wq) * inv_scale)
    w_qkv = w_qkv.at[EMBED:2 * EMBED, EMBED:2 * EMBED].set(per_head_block(wk))
    w_qkv = w_qkv.at[2 * EMBED:3 * EMBED, 2 * EMBED:3 * EMBED].set(per_head_block(wv))

    # pack the 7 tiny bias / layernorm vectors into one (8, HIDDEN) f32 buffer
    def row(v):
        v = v.reshape(1, -1)
        return jnp.pad(v, ((0, 0), (0, HIDDEN - v.shape[1])))
    vecs = jnp.concatenate([row(bo), row(b1), row(b2), row(g1), row(be1),
                            row(g2), row(be2), jnp.zeros((1, HIDDEN), jnp.float32)], axis=0)

    return (w_qkv.astype(jnp.bfloat16),       # (3E, 3E)
            wo.T.astype(jnp.bfloat16),        # (E, E)
            w1.T.astype(jnp.bfloat16),        # (E, HIDDEN)
            w2.T.astype(jnp.bfloat16),        # (HIDDEN, E)
            vecs)                             # (8, HIDDEN) f32


@jax.jit
def transformer_block(value, key, query, mask, prep):
    w_qkv, wo_t, w1_t, w2_t, vecs = prep
    N, S, E = query.shape
    NS = N * S

    # activation-side prep (cheap, per-call): flatten batch and pack q|k|v lanes
    q2d = query.reshape(NS, E)                                     # residual input, f32
    qkv_in = jnp.concatenate(
        [q2d, key.reshape(NS, E), value.reshape(NS, E)], axis=-1).astype(jnp.bfloat16)

    # block-diagonal additive attention mask over the flattened (N*S) axis:
    # cross-batch entries and masked entries get -1e30 (exp -> exactly 0), others 0.
    mask_add = jnp.full((NS, NS), NEG_INF, jnp.float32)
    for n in range(N):
        blk = jnp.where(mask[n, 0] == 0, NEG_INF, jnp.float32(0.0))
        mask_add = mask_add.at[n * S:(n + 1) * S, n * S:(n + 1) * S].set(blk)

    out2d = pl.pallas_call(
        transformer_block_kernel,
        out_shape=jax.ShapeDtypeStruct((NS, E), jnp.float32),
    )(qkv_in, q2d, mask_add, w_qkv, wo_t, w1_t, w2_t, vecs)
    return out2d.reshape(N, S, E)


# ---------------- pure-JAX reference (mirrors the PyTorch forward) ----------------
def reference(value, key, query, mask, params):
    (wv, wk, wq, wo, bo, w1, b1, w2, b2, g1, be1, g2, be2) = params
    N, S, E = query.shape
    v = value.reshape(N, S, HEADS, HEAD_DIM) @ wv.T
    k = key.reshape(N, S, HEADS, HEAD_DIM) @ wk.T
    q = query.reshape(N, S, HEADS, HEAD_DIM) @ wq.T
    energy = jnp.einsum("nqhd,nkhd->nhqk", q, k)
    energy = jnp.where(mask == 0, -1e20, energy)
    attn = jax.nn.softmax(energy / math.sqrt(EMBED), axis=3)
    out = jnp.einsum("nhql,nlhd->nqhd", attn, v).reshape(N, S, E)
    out = out @ wo.T + bo[0]

    def ln(x, g, b):
        mu = x.mean(-1, keepdims=True)
        var = ((x - mu) ** 2).mean(-1, keepdims=True)
        return (x - mu) / jnp.sqrt(var + LN_EPS) * g[0] + b[0]

    x = ln(out + query, g1, be1)
    ff = jnp.maximum(x @ w1.T + b1[0], 0.0) @ w2.T + b2[0]
    return ln(ff + x, g2, be2)


if __name__ == "__main__":
    root = jax.random.PRNGKey(0)
    ks = jax.random.split(root, 16)

    value = jax.random.normal(ks[0], (BATCH, SEQ, EMBED), jnp.float32)
    key_in = jax.random.normal(ks[1], (BATCH, SEQ, EMBED), jnp.float32)
    query = jax.random.normal(ks[2], (BATCH, SEQ, EMBED), jnp.float32)
    # causal mask, shape (N, 1, S, S), broadcast over heads
    mask = jnp.broadcast_to(jnp.tril(jnp.ones((SEQ, SEQ), jnp.float32)),
                            (BATCH, 1, SEQ, SEQ))

    def init(k, shape, scale=0.1):
        return scale * jax.random.normal(k, shape, jnp.float32)

    params = (
        init(ks[3], (HEAD_DIM, HEAD_DIM)),          # values proj  (no bias)
        init(ks[4], (HEAD_DIM, HEAD_DIM)),          # keys proj    (no bias)
        init(ks[5], (HEAD_DIM, HEAD_DIM)),          # queries proj (no bias)
        init(ks[6], (EMBED, EMBED)),                # fc_out weight
        init(ks[7], (1, EMBED)),                    # fc_out bias
        init(ks[8], (HIDDEN, EMBED)),               # ff linear1 weight
        init(ks[9], (1, HIDDEN)),                   # ff linear1 bias
        init(ks[10], (EMBED, HIDDEN)),              # ff linear2 weight
        init(ks[11], (1, EMBED)),                   # ff linear2 bias
        jnp.ones((1, EMBED), jnp.float32),          # norm1 gamma
        jnp.zeros((1, EMBED), jnp.float32),         # norm1 beta
        jnp.ones((1, EMBED), jnp.float32),          # norm2 gamma
        jnp.zeros((1, EMBED), jnp.float32),         # norm2 beta
    )

    prep = prepare_params(params)                   # one-time weight prep (hoisted)

    out = transformer_block(value, key_in, query, mask, prep)
    out = jax.block_until_ready(out)

    ref = reference(value, key_in, query, mask, params)
    assert out.shape == (BATCH, SEQ, EMBED)
    # Tolerance 2e-2: MXU operands are bf16 (f32 accumulation) and the softmax
    # denominator uses the approximate EUP reciprocal; observed deviation is a
    # few 1e-3 on O(1) layernormed outputs.
    assert jnp.allclose(out, ref, atol=2e-2, rtol=2e-2), "mismatch vs reference"
    print("KERNEL_OK")
</pallas_src>

<mosaic_0001>
module attributes {stable_mosaic.version = 11 : i64} {
  func.func @transformer_block_kernel(%arg0: memref<16x96xbf16, #tpu.memory_space<vmem>>, %arg1: memref<16x32xf32, #tpu.memory_space<vmem>>, %arg2: memref<16x16xf32, #tpu.memory_space<vmem>>, %arg3: memref<96x96xbf16, #tpu.memory_space<vmem>>, %arg4: memref<32x32xbf16, #tpu.memory_space<vmem>>, %arg5: memref<32x64xbf16, #tpu.memory_space<vmem>>, %arg6: memref<64x32xbf16, #tpu.memory_space<vmem>>, %arg7: memref<8x64xf32, #tpu.memory_space<vmem>>, %arg8: memref<16x32xf32, #tpu.memory_space<vmem>>) attributes {dimension_semantics = [], scalar_prefetch = 0 : i64, scratch_operands = 0 : i64, tpu.core_type = #tpu.core_type<tc>} {
    %c0 = arith.constant 0 : index
    %c0_0 = arith.constant 0 : index
    %0 = vector.load %arg0[%c0, %c0_0] : memref<16x96xbf16, #tpu.memory_space<vmem>>, vector<16x96xbf16>
    %c0_1 = arith.constant 0 : index
    %c0_2 = arith.constant 0 : index
    %1 = vector.load %arg3[%c0_1, %c0_2] : memref<96x96xbf16, #tpu.memory_space<vmem>>, vector<96x96xbf16>
    %cst = arith.constant dense<0.000000e+00> : vector<16x96xf32>
    %2 = tpu.matmul %0, %1, %cst {dimension_numbers = #tpu.dot_dimension_numbers<[1], [0], [0], [1], [0, 0, 1, 1], [], []>} : vector<16x96xbf16>, vector<96x96xbf16>, vector<16x96xf32> -> vector<16x96xf32>
    %c0_3 = arith.constant 0 : index
    %c0_4 = arith.constant 0 : index
    %3 = vector.load %arg2[%c0_3, %c0_4] : memref<16x16xf32, #tpu.memory_space<vmem>>, vector<16x16xf32>
    %4 = vector.extract_strided_slice %2 {offsets = [0, 0], sizes = [16, 8], strides = [1, 1]} : vector<16x96xf32> to vector<16x8xf32>
    %5 = arith.truncf %4 : vector<16x8xf32> to vector<16x8xbf16>
    %6 = vector.extract_strided_slice %2 {offsets = [0, 32], sizes = [16, 8], strides = [1, 1]} : vector<16x96xf32> to vector<16x8xf32>
    %7 = arith.truncf %6 : vector<16x8xf32> to vector<16x8xbf16>
    %8 = vector.extract_strided_slice %2 {offsets = [0, 64], sizes = [16, 8], strides = [1, 1]} : vector<16x96xf32> to vector<16x8xf32>
    %9 = arith.truncf %8 : vector<16x8xf32> to vector<16x8xbf16>
    "tpu.trace_start"() <{level = 10 : i32, message = "qd,kd->qk"}> : () -> ()
    %cst_5 = arith.constant dense<0.000000e+00> : vector<16x16xf32>
    %10 = tpu.matmul %5, %7, %cst_5 {dimension_numbers = #tpu.dot_dimension_numbers<[1], [1], [0], [0], [0, 0, 1, 0], [], []>} : vector<16x8xbf16>, vector<16x8xbf16>, vector<16x16xf32> -> vector<16x16xf32>
    "tpu.trace_stop"() : () -> ()
    %11 = arith.addf %10, %3 : vector<16x16xf32>
    %cst_6 = arith.constant dense<0xFF800000> : vector<16xf32>
    %12 = vector.multi_reduction <maximumf>, %11, %cst_6 [1] : vector<16x16xf32> to vector<16xf32>
    %13 = vector.shape_cast %12 : vector<16xf32> to vector<16x1xf32>
    %14 = vector.broadcast %13 : vector<16x1xf32> to vector<16x16xf32>
    %15 = arith.subf %11, %14 : vector<16x16xf32>
    %16 = math.exp %15 : vector<16x16xf32>
    %cst_7 = arith.constant dense<0.000000e+00> : vector<16xf32>
    %17 = vector.multi_reduction <add>, %16, %cst_7 [1] : vector<16x16xf32> to vector<16xf32>
    %18 = vector.shape_cast %17 : vector<16xf32> to vector<16x1xf32>
    %19 = tpu.reciprocal %18 {approx = true} : vector<16x1xf32> -> vector<16x1xf32>
    %20 = vector.broadcast %19 : vector<16x1xf32> to vector<16x16xf32>
    %21 = arith.mulf %16, %20 : vector<16x16xf32>
    %22 = arith.truncf %21 : vector<16x16xf32> to vector<16x16xbf16>
    %cst_8 = arith.constant dense<0.000000e+00> : vector<16x8xf32>
    %23 = tpu.matmul %22, %9, %cst_8 {dimension_numbers = #tpu.dot_dimension_numbers<[1], [0], [0], [1], [0, 0, 1, 1], [], []>} : vector<16x16xbf16>, vector<16x8xbf16>, vector<16x8xf32> -> vector<16x8xf32>
    %24 = vector.extract_strided_slice %2 {offsets = [0, 8], sizes = [16, 8], strides = [1, 1]} : vector<16x96xf32> to vector<16x8xf32>
    %25 = arith.truncf %24 : vector<16x8xf32> to vector<16x8xbf16>
    %26 = vector.extract_strided_slice %2 {offsets = [0, 40], sizes = [16, 8], strides = [1, 1]} : vector<16x96xf32> to vector<16x8xf32>
    %27 = arith.truncf %26 : vector<16x8xf32> to vector<16x8xbf16>
    %28 = vector.extract_strided_slice %2 {offsets = [0, 72], sizes = [16, 8], strides = [1, 1]} : vector<16x96xf32> to vector<16x8xf32>
    %29 = arith.truncf %28 : vector<16x8xf32> to vector<16x8xbf16>
    "tpu.trace_start"() <{level = 10 : i32, message = "qd,kd->qk"}> : () -> ()
    %cst_9 = arith.constant dense<0.000000e+00> : vector<16x16xf32>
    %30 = tpu.matmul %25, %27, %cst_9 {dimension_numbers = #tpu.dot_dimension_numbers<[1], [1], [0], [0], [0, 0, 1, 0], [], []>} : vector<16x8xbf16>, vector<16x8xbf16>, vector<16x16xf32> -> vector<16x16xf32>
    "tpu.trace_stop"() : () -> ()
    %31 = arith.addf %30, %3 : vector<16x16xf32>
    %cst_10 = arith.constant dense<0xFF800000> : vector<16xf32>
    %32 = vector.multi_reduction <maximumf>, %31, %cst_10 [1] : vector<16x16xf32> to vector<16xf32>
    %33 = vector.shape_cast %32 : vector<16xf32> to vector<16x1xf32>
    %34 = vector.broadcast %33 : vector<16x1xf32> to vector<16x16xf32>
    %35 = arith.subf %31, %34 : vector<16x16xf32>
    %36 = math.exp %35 : vector<16x16xf32>
    %cst_11 = arith.constant dense<0.000000e+00> : vector<16xf32>
    %37 = vector.multi_reduction <add>, %36, %cst_11 [1] : vector<16x16xf32> to vector<16xf32>
    %38 = vector.shape_cast %37 : vector<16xf32> to vector<16x1xf32>
    %39 = tpu.reciprocal %38 {approx = true} : vector<16x1xf32> -> vector<16x1xf32>
    %40 = vector.broadcast %39 : vector<16x1xf32> to vector<16x16xf32>
    %41 = arith.mulf %36, %40 : vector<16x16xf32>
    %42 = arith.truncf %41 : vector<16x16xf32> to vector<16x16xbf16>
    %cst_12 = arith.constant dense<0.000000e+00> : vector<16x8xf32>
    %43 = tpu.matmul %42, %29, %cst_12 {dimension_numbers = #tpu.dot_dimension_numbers<[1], [0], [0], [1], [0, 0, 1, 1], [], []>} : vector<16x16xbf16>, vector<16x8xbf16>, vector<16x8xf32> -> vector<16x8xf32>
    %44 = vector.extract_strided_slice %2 {offsets = [0, 16], sizes = [16, 8], strides = [1, 1]} : vector<16x96xf32> to vector<16x8xf32>
    %45 = arith.truncf %44 : vector<16x8xf32> to vector<16x8xbf16>
    %46 = vector.extract_strided_slice %2 {offsets = [0, 48], sizes = [16, 8], strides = [1, 1]} : vector<16x96xf32> to vector<16x8xf32>
    %47 = arith.truncf %46 : vector<16x8xf32> to vector<16x8xbf16>
    %48 = vector.extract_strided_slice %2 {offsets = [0, 80], sizes = [16, 8], strides = [1, 1]} : vector<16x96xf32> to vector<16x8xf32>
    %49 = arith.truncf %48 : vector<16x8xf32> to vector<16x8xbf16>
    "tpu.trace_start"() <{level = 10 : i32, message = "qd,kd->qk"}> : () -> ()
    %cst_13 = arith.constant dense<0.000000e+00> : vector<16x16xf32>
    %50 = tpu.matmul %45, %47, %cst_13 {dimension_numbers = #tpu.dot_dimension_numbers<[1], [1], [0], [0], [0, 0, 1, 0], [], []>} : vector<16x8xbf16>, vector<16x8xbf16>, vector<16x16xf32> -> vector<16x16xf32>
    "tpu.trace_stop"() : () -> ()
    %51 = arith.addf %50, %3 : vector<16x16xf32>
    %cst_14 = arith.constant dense<0xFF800000> : vector<16xf32>
    %52 = vector.multi_reduction <maximumf>, %51, %cst_14 [1] : vector<16x16xf32> to vector<16xf32>
    %53 = vector.shape_cast %52 : vector<16xf32> to vector<16x1xf32>
    %54 = vector.broadcast %53 : vector<16x1xf32> to vector<16x16xf32>
    %55 = arith.subf %51, %54 : vector<16x16xf32>
    %56 = math.exp %55 : vector<16x16xf32>
    %cst_15 = arith.constant dense<0.000000e+00> : vector<16xf32>
    %57 = vector.multi_reduction <add>, %56, %cst_15 [1] : vector<16x16xf32> to vector<16xf32>
    %58 = vector.shape_cast %57 : vector<16xf32> to vector<16x1xf32>
    %59 = tpu.reciprocal %58 {approx = true} : vector<16x1xf32> -> vector<16x1xf32>
    %60 = vector.broadcast %59 : vector<16x1xf32> to vector<16x16xf32>
    %61 = arith.mulf %56, %60 : vector<16x16xf32>
    %62 = arith.truncf %61 : vector<16x16xf32> to vector<16x16xbf16>
    %cst_16 = arith.constant dense<0.000000e+00> : vector<16x8xf32>
    %63 = tpu.matmul %62, %49, %cst_16 {dimension_numbers = #tpu.dot_dimension_numbers<[1], [0], [0], [1], [0, 0, 1, 1], [], []>} : vector<16x16xbf16>, vector<16x8xbf16>, vector<16x8xf32> -> vector<16x8xf32>
    %64 = vector.extract_strided_slice %2 {offsets = [0, 24], sizes = [16, 8], strides = [1, 1]} : vector<16x96xf32> to vector<16x8xf32>
    %65 = arith.truncf %64 : vector<16x8xf32> to vector<16x8xbf16>
    %66 = vector.extract_strided_slice %2 {offsets = [0, 56], sizes = [16, 8], strides = [1, 1]} : vector<16x96xf32> to vector<16x8xf32>
    %67 = arith.truncf %66 : vector<16x8xf32> to vector<16x8xbf16>
    %68 = vector.extract_strided_slice %2 {offsets = [0, 88], sizes = [16, 8], strides = [1, 1]} : vector<16x96xf32> to vector<16x8xf32>
    %69 = arith.truncf %68 : vector<16x8xf32> to vector<16x8xbf16>
    "tpu.trace_start"() <{level = 10 : i32, message = "qd,kd->qk"}> : () -> ()
    %cst_17 = arith.constant dense<0.000000e+00> : vector<16x16xf32>
    %70 = tpu.matmul %65, %67, %cst_17 {dimension_numbers = #tpu.dot_dimension_numbers<[1], [1], [0], [0], [0, 0, 1, 0], [], []>} : vector<16x8xbf16>, vector<16x8xbf16>, vector<16x16xf32> -> vector<16x16xf32>
    "tpu.trace_stop"() : () -> ()
    %71 = arith.addf %70, %3 : vector<16x16xf32>
    %cst_18 = arith.constant dense<0xFF800000> : vector<16xf32>
    %72 = vector.multi_reduction <maximumf>, %71, %cst_18 [1] : vector<16x16xf32> to vector<16xf32>
    %73 = vector.shape_cast %72 : vector<16xf32> to vector<16x1xf32>
    %74 = vector.broadcast %73 : vector<16x1xf32> to vector<16x16xf32>
    %75 = arith.subf %71, %74 : vector<16x16xf32>
    %76 = math.exp %75 : vector<16x16xf32>
    %cst_19 = arith.constant dense<0.000000e+00> : vector<16xf32>
    %77 = vector.multi_reduction <add>, %76, %cst_19 [1] : vector<16x16xf32> to vector<16xf32>
    %78 = vector.shape_cast %77 : vector<16xf32> to vector<16x1xf32>
    %79 = tpu.reciprocal %78 {approx = true} : vector<16x1xf32> -> vector<16x1xf32>
    %80 = vector.broadcast %79 : vector<16x1xf32> to vector<16x16xf32>
    %81 = arith.mulf %76, %80 : vector<16x16xf32>
    %82 = arith.truncf %81 : vector<16x16xf32> to vector<16x16xbf16>
    %cst_20 = arith.constant dense<0.000000e+00> : vector<16x8xf32>
    %83 = tpu.matmul %82, %69, %cst_20 {dimension_numbers = #tpu.dot_dimension_numbers<[1], [0], [0], [1], [0, 0, 1, 1], [], []>} : vector<16x16xbf16>, vector<16x8xbf16>, vector<16x8xf32> -> vector<16x8xf32>
    %84 = tpu.concatenate %23, %43, %63, %83 in 1 : vector<16x8xf32>, vector<16x8xf32>, vector<16x8xf32>, vector<16x8xf32> -> vector<16x32xf32>
    %85 = arith.truncf %84 : vector<16x32xf32> to vector<16x32xbf16>
    %c0_21 = arith.constant 0 : index
    %c0_22 = arith.constant 0 : index
    %86 = vector.load %arg4[%c0_21, %c0_22] : memref<32x32xbf16, #tpu.memory_space<vmem>>, vector<32x32xbf16>
    %cst_23 = arith.constant dense<0.000000e+00> : vector<16x32xf32>
    %87 = tpu.matmul %85, %86, %cst_23 {dimension_numbers = #tpu.dot_dimension_numbers<[1], [0], [0], [1], [0, 0, 1, 1], [], []>} : vector<16x32xbf16>, vector<32x32xbf16>, vector<16x32xf32> -> vector<16x32xf32>
    %c0_24 = arith.constant 0 : index
    %c0_25 = arith.constant 0 : index
    %88 = vector.load %arg7[%c0_24, %c0_25] : memref<8x64xf32, #tpu.memory_space<vmem>>, vector<8x64xf32>
    %89 = vector.extract_strided_slice %88 {offsets = [0, 0], sizes = [1, 32], strides = [1, 1]} : vector<8x64xf32> to vector<1x32xf32>
    %90 = vector.extract_strided_slice %88 {offsets = [1, 0], sizes = [1, 64], strides = [1, 1]} : vector<8x64xf32> to vector<1x64xf32>
    %91 = vector.extract_strided_slice %88 {offsets = [2, 0], sizes = [1, 32], strides = [1, 1]} : vector<8x64xf32> to vector<1x32xf32>
    %92 = vector.extract_strided_slice %88 {offsets = [3, 0], sizes = [1, 32], strides = [1, 1]} : vector<8x64xf32> to vector<1x32xf32>
    %93 = vector.extract_strided_slice %88 {offsets = [4, 0], sizes = [1, 32], strides = [1, 1]} : vector<8x64xf32> to vector<1x32xf32>
    %94 = vector.extract_strided_slice %88 {offsets = [5, 0], sizes = [1, 32], strides = [1, 1]} : vector<8x64xf32> to vector<1x32xf32>
    %95 = vector.extract_strided_slice %88 {offsets = [6, 0], sizes = [1, 32], strides = [1, 1]} : vector<8x64xf32> to vector<1x32xf32>
    %96 = vector.broadcast %89 : vector<1x32xf32> to vector<16x32xf32>
    %97 = arith.addf %87, %96 : vector<16x32xf32>
    %c0_26 = arith.constant 0 : index
    %c0_27 = arith.constant 0 : index
    %98 = vector.load %arg1[%c0_26, %c0_27] : memref<16x32xf32, #tpu.memory_space<vmem>>, vector<16x32xf32>
    %99 = arith.addf %97, %98 : vector<16x32xf32>
    %cst_28 = arith.constant dense<0.000000e+00> : vector<16xf32>
    %100 = vector.multi_reduction <add>, %99, %cst_28 [1] : vector<16x32xf32> to vector<16xf32>
    %101 = vector.shape_cast %100 : vector<16xf32> to vector<16x1xf32>
    %cst_29 = arith.constant 3.200000e+01 : f32
    %102 = vector.broadcast %cst_29 : f32 to vector<16x1xf32>
    %103 = arith.divf %101, %102 : vector<16x1xf32>
    %104 = vector.broadcast %103 : vector<16x1xf32> to vector<16x32xf32>
    %105 = arith.subf %99, %104 : vector<16x32xf32>
    %106 = arith.mulf %105, %105 : vector<16x32xf32>
    %cst_30 = arith.constant dense<0.000000e+00> : vector<16xf32>
    %107 = vector.multi_reduction <add>, %106, %cst_30 [1] : vector<16x32xf32> to vector<16xf32>
    %108 = vector.shape_cast %107 : vector<16xf32> to vector<16x1xf32>
    %cst_31 = arith.constant 3.200000e+01 : f32
    %109 = vector.broadcast %cst_31 : f32 to vector<16x1xf32>
    %110 = arith.divf %108, %109 : vector<16x1xf32>
    %111 = vector.broadcast %103 : vector<16x1xf32> to vector<16x32xf32>
    %112 = arith.subf %99, %111 : vector<16x32xf32>
    %cst_32 = arith.constant 9.99999974E-6 : f32
    %113 = vector.broadcast %cst_32 : f32 to vector<16x1xf32>
    %114 = arith.addf %110, %113 : vector<16x1xf32>
    %115 = math.rsqrt %114 : vector<16x1xf32>
    %116 = vector.broadcast %115 : vector<16x1xf32> to vector<16x32xf32>
    %117 = arith.mulf %112, %116 : vector<16x32xf32>
    %118 = vector.broadcast %92 : vector<1x32xf32> to vector<16x32xf32>
    %119 = arith.mulf %117, %118 : vector<16x32xf32>
    %120 = vector.broadcast %93 : vector<1x32xf32> to vector<16x32xf32>
    %121 = arith.addf %119, %120 : vector<16x32xf32>
    %122 = arith.truncf %121 : vector<16x32xf32> to vector<16x32xbf16>
    %c0_33 = arith.constant 0 : index
    %c0_34 = arith.constant 0 : index
    %123 = vector.load %arg5[%c0_33, %c0_34] : memref<32x64xbf16, #tpu.memory_space<vmem>>, vector<32x64xbf16>
    %cst_35 = arith.constant dense<0.000000e+00> : vector<16x64xf32>
    %124 = tpu.matmul %122, %123, %cst_35 {dimension_numbers = #tpu.dot_dimension_numbers<[1], [0], [0], [1], [0, 0, 1, 1], [], []>} : vector<16x32xbf16>, vector<32x64xbf16>, vector<16x64xf32> -> vector<16x64xf32>
    %125 = vector.broadcast %90 : vector<1x64xf32> to vector<16x64xf32>
    %126 = arith.addf %124, %125 : vector<16x64xf32>
    %cst_36 = arith.constant 0.000000e+00 : f32
    %127 = vector.broadcast %cst_36 : f32 to vector<16x64xf32>
    %128 = arith.maximumf %126, %127 : vector<16x64xf32>
    %129 = arith.truncf %128 : vector<16x64xf32> to vector<16x64xbf16>
    %c0_37 = arith.constant 0 : index
    %c0_38 = arith.constant 0 : index
    %130 = vector.load %arg6[%c0_37, %c0_38] : memref<64x32xbf16, #tpu.memory_space<vmem>>, vector<64x32xbf16>
    %cst_39 = arith.constant dense<0.000000e+00> : vector<16x32xf32>
    %131 = tpu.matmul %129, %130, %cst_39 {dimension_numbers = #tpu.dot_dimension_numbers<[1], [0], [0], [1], [0, 0, 1, 1], [], []>} : vector<16x64xbf16>, vector<64x32xbf16>, vector<16x32xf32> -> vector<16x32xf32>
    %132 = vector.broadcast %91 : vector<1x32xf32> to vector<16x32xf32>
    %133 = arith.addf %131, %132 : vector<16x32xf32>
    %134 = arith.addf %133, %121 : vector<16x32xf32>
    %cst_40 = arith.constant dense<0.000000e+00> : vector<16xf32>
    %135 = vector.multi_reduction <add>, %134, %cst_40 [1] : vector<16x32xf32> to vector<16xf32>
    %136 = vector.shape_cast %135 : vector<16xf32> to vector<16x1xf32>
    %cst_41 = arith.constant 3.200000e+01 : f32
    %137 = vector.broadcast %cst_41 : f32 to vector<16x1xf32>
    %138 = arith.divf %136, %137 : vector<16x1xf32>
    %139 = vector.broadcast %138 : vector<16x1xf32> to vector<16x32xf32>
    %140 = arith.subf %134, %139 : vector<16x32xf32>
    %141 = arith.mulf %140, %140 : vector<16x32xf32>
    %cst_42 = arith.constant dense<0.000000e+00> : vector<16xf32>
    %142 = vector.multi_reduction <add>, %141, %cst_42 [1] : vector<16x32xf32> to vector<16xf32>
    %143 = vector.shape_cast %142 : vector<16xf32> to vector<16x1xf32>
    %cst_43 = arith.constant 3.200000e+01 : f32
    %144 = vector.broadcast %cst_43 : f32 to vector<16x1xf32>
    %145 = arith.divf %143, %144 : vector<16x1xf32>
    %146 = vector.broadcast %138 : vector<16x1xf32> to vector<16x32xf32>
    %147 = arith.subf %134, %146 : vector<16x32xf32>
    %cst_44 = arith.constant 9.99999974E-6 : f32
    %148 = vector.broadcast %cst_44 : f32 to vector<16x1xf32>
    %149 = arith.addf %145, %148 : vector<16x1xf32>
    %150 = math.rsqrt %149 : vector<16x1xf32>
    %151 = vector.broadcast %150 : vector<16x1xf32> to vector<16x32xf32>
    %152 = arith.mulf %147, %151 : vector<16x32xf32>
    %153 = vector.broadcast %94 : vector<1x32xf32> to vector<16x32xf32>
    %154 = arith.mulf %152, %153 : vector<16x32xf32>
    %155 = vector.broadcast %95 : vector<1x32xf32> to vector<16x32xf32>
    %156 = arith.addf %154, %155 : vector<16x32xf32>
    %c0_45 = arith.constant 0 : index
    %c0_46 = arith.constant 0 : index
    %157 = vector.load %arg8[%c0_45, %c0_46] : memref<16x32xf32, #tpu.memory_space<vmem>>, vector<16x32xf32>
    tpu.vector_store %arg8[%c0_45, %c0_46], %156 {strides = array<i32>} : memref<16x32xf32, #tpu.memory_space<vmem>>, vector<16x32xf32>,
    return
  }
}

</mosaic_0001>

<bundles_post_ra>
// kernel: transformer_block.1
= control target key start
LH: loop header
LB: loop body
LE: loop exit
PB: predicated region body
PF: predicated region fallthrough
CT: control target
= control target key end

     0   :  { %v1232_v1 = vmov 0.0   ;;  %vm1233_vm0 = vmmov 0   ;;  %s1509_s0 = inlined_call_operand.vmem [shape: bf16[16,96], index: 0, kind: input, shape index: {}]   ;;  %s1510_s1 = inlined_call_operand.vmem [shape: f32[16,32], index: 1, kind: input, shape index: {}]   ;;  %s1511_s2 = inlined_call_operand.vmem [shape: f32[16,16], index: 2, kind: input, shape index: {}]   ;;  %s1512_s3 = inlined_call_operand.vmem [shape: bf16[96,96], index: 3, kind: input, shape index: {}]   ;;  %s1513_s4 = inlined_call_operand.vmem [shape: bf16[32,32], index: 4, kind: input, shape index: {}]   ;;  %s1514_s5 = inlined_call_operand.vmem [shape: bf16[32,64], index: 5, kind: input, shape index: {}]   ;;  %s1515_s6 = inlined_call_operand.vmem [shape: bf16[64,32], index: 6, kind: input, shape index: {}]   ;;  %s1516_s7 = inlined_call_operand.vmem [shape: f32[8,64], index: 7, kind: input, shape index: {}]   ;;  %s1517_s8 = inlined_call_operand.hbm [shape: f32[16,32], index: 8, kind: output, shape index: {}]  }
   0x1   :  { %v1153_v0 = vld [vmem:[%s1512_s3] sm:$0xff]   ;;  %1028 = vmatprep.subr.bf16.mxu0 %v1232_v1  ;;  %1044 = vmatprep.subr.bf16.mxu1 %v1232_v1  ;;  %v1154_v2 = vld [vmem:[%s1512_s3 + $0x8] sm:$0xff]   ;;  %v1155_v3 = vld [vmem:[%s1512_s3 + $0x10] sm:$0xff]  }
   0x2   :  { %1029 = vmatpush3.bf16.msra.mxu0 %v1153_v0  ;;  %1040 = vmatprep.mubr.msk.bf16.mxu0 %vm1233_vm0, %v1232_v1  ;;  %v1156_v4 = vld [vmem:[%s1512_s3 + $0x18] sm:$0xff]  }
   0x3   :  { %1030 = vmatprep.subr.bf16.mxu0 %v1232_v1  ;;  %1046 = vmatprep.mubr.msk.bf16.mxu1 %vm1233_vm0, %v1232_v1 }
   0x6   :  { %1031 = vmatpush3.bf16.msra.mxu0 %v1154_v2 }
   0x7   :  { %1032 = vmatprep.subr.bf16.mxu0 %v1232_v1 }
   0xa   :  { %1033 = vmatpush3.bf16.msra.mxu0 %v1155_v3 }
   0xb   :  { %1034 = vmatprep.subr.bf16.mxu0 %v1232_v1 }
   0xc   :  { %13 = vsyncpa [#allocation3], 0  ;;  %v1157_v5 = vld [vmem:[%s1512_s3 + $0x20] sm:$0xff]   ;;  %v1158_v6 = vld [vmem:[%s1512_s3 + $0x28] sm:$0xff]   ;;  %vm86_vm1 = vcmask 785408   ;;  %s1234_s3 = smov 96  }
   0xd   :  { %v1159_v7 = vld [vmem:[%s1509_s0] sm:$0xff]   ;;  %vm137_vm2 = vcmask 64512   ;;  %v1347_v17 = vld [vmem:[%s1511_s2 + $0x8] sm:$0xff]  ;;  %vm185_vm3 = vcmask 130048   ;;  %s1235_s22 = smov 64   ;;  %s1236_s23 = smov 80  }
   0xe   :  { %1035 = vmatpush3.bf16.msra.mxu0 %v1156_v4  ;;  %v1342_v15 = vld [vmem:[%s1511_s2] sm:$0xff]  ;;  %s1237_s2 = smov 88   ;;  %s1238_s24 = smov 120   ;;  %vm647_vm4 = vcmask 195584   ;;  %vm672_vm5 = vcmask 261120   ;;  %vm864_vm6 = vcmask 523264  }
   0xf   :  { %1036 = vmatprep.subr.bf16.mxu0 %v1232_v1  ;;  %s1239_s25 = smov 112   ;;  %s1240_s26 = smov 72  }
  0x10   :  { %s1241_s27 = smov 104   ;;  %s1242_s28 = smov 56  }
  0x11   :  { %s1243_s29 = smov 40   ;;  %s1244_s30 = smov 48  }
  0x12   :  { %1037 = vmatpush3.bf16.msra.mxu0 %v1157_v5  ;;  %s1245_s11 = smov 8   ;;  %s1246_s14 = smov 16  }
  0x13   :  { %1038 = vmatprep.subr.bf16.mxu0 %v1232_v1  ;;  %s1247_s15 = smov 24  }
  0x16   :  { %1039 = vmatpush3.bf16.msra.mxu0 %v1158_v6 }
  0x17   :  { %1062 = vmatprep.subr.bf16.mxu0 %v1232_v1 }
  0x19   :  { %1041 = vmatmul.mubr.msk.bf16.vlgmr.msra.gmra.mrb[0].mxu0 %vm86_vm1, %v1159_v7 }
  0x1a   :  { %1064 = vmatprep.mubr.msk.bf16.mxu0 %vm1233_vm0, %v1232_v1 }
  0xec   :  { %v124_v8 = vpop.f32.mrb[0].mxu0 }
  0xed   :  { %v1042_v9 = vpop.f32.mrb[1].mxu0 }
  0xee   :  { %v127_v10 = vpop.f32.mrb[2].mxu0 }
  0xef   :  { %v1330_v11 = vpack.c.bf16 %v127_v10, %v124_v8  ;;  %v1043_v12 = vpop.f32.mrb[3].mxu0 }
  0xf1   :  { %135 = vrot.lane.b32.xlu0 %v1330_v11, %s1234_s3 }
 0x163   :  { %v136_v13 = vpop.permute.xlu0 %135 }
 0x164   :  { %v142_v14 = vsel %vm137_vm2, %v136_v13, 0 }
 0x165   :  { %1045 = vmatpush3.bf16.xpose.msra.mxu1 %v142_v14 }
 0x166   :  { %1050 = vmatprep.subr.bf16.mxu1 %v1232_v1 }
 0x16c   :  { %1047 = vmatmul.mubr.msk.bf16.vlgmr.msra.gmra.mrb[0].mxu1 %vm137_vm2, %v1330_v11 }
 0x16d   :  { %1052 = vmatprep.mubr.msk.bf16.mxu1 %vm1233_vm0, %v1232_v1 }
 0x23f   :  { %v178_v16 = vpop.f32.mrb[0].mxu1 }
 0x240   :  { %v179_v18 = vadd.f32 %v178_v16, %v1342_v15  ;;  %v1048_v19 = vpop.f32.mrb[1].mxu1 }
 0x241   :  { %v181_v20 = vpop.f32.mrb[2].mxu1 }
 0x242   :  { %v182_v21 = vadd.f32 %v181_v20, %v1347_v17  ;;  %v1049_v22 = vpop.f32.mrb[3].mxu1  ;;  %v186_v23 = vsel %vm185_vm3, %v179_v18, -inf }
 0x243   :  { %187 = vmax.xlane.f32.xlu0 %v186_v23 }
 0x244   :  { %v189_v24 = vsel %vm185_vm3, %v182_v21, -inf }
 0x245   :  { %190 = vmax.xlane.f32.xlu1 %v189_v24 }
 0x256   :  { %209 = vrot.lane.b32.xlu1 %v1330_v11, %s1235_s22 }
 0x259   :  { %379 = vrot.lane.b32.xlu0 %v1330_v11, %s1236_s23 }
 0x2d0   :  { %v188_v25 = vpop.xlane.xlu0 %187 }
 0x2d1   :  { %v192_v26 = vsub.f32 %v179_v18, %v188_v25 }
 0x2d2   :  { %v191_v27 = vpop.xlane.xlu1 %190 }
 0x2d3   :  { %v194_v28 = vmul.f32 1.442695, %v192_v26  ;;  %v193_v29 = vsub.f32 %v182_v21, %v191_v27 }
 0x2d4   :  { %v380_v46 = vpop.permute.xlu0 %379 }
 0x2d5   :  { %1168 = vpow2.f32 %v194_v28  ;;  %v196_v30 = vmul.f32 1.442695, %v193_v29  ;;  %v385_v48 = vsel %vm137_vm2, %v380_v46, 0 }
 0x2d6   :  { %v210_v31 = vpop.permute.xlu1 %209 }
 0x2d7   :  { %1170 = vpow2.f32 %v196_v30  ;;  %1051 = vmatpush3.bf16.msra.mxu1 %v210_v31 }
 0x2d8   :  { %1056 = vmatprep.subr.bf16.mxu1 %v1232_v1 }
 0x2df   :  { %v1169_v32 = vpop.eup %1168 }
 0x2e0   :  { %v198_v33 = vsel %vm185_vm3, %v1169_v32, 0.0 }
 0x2e1   :  { %v1171_v34 = vpop.eup %1170  ;;  %199 = vadd.xlane.f32.xlu1 %v198_v33 }
 0x2e2   :  { %v201_v35 = vsel %vm185_vm3, %v1171_v34, 0.0 }
 0x2e5   :  { %202 = vadd.xlane.f32.xlu1 %v201_v35 }
 0x2f6   :  { %258 = vrot.lane.b32.xlu1 %v1330_v11, %s1237_s2 }
 0x2fa   :  { %256 = vrot.lane.b32.xlu1 %v1330_v11, %s1238_s24 }
 0x2fe   :  { %377 = vrot.lane.b32.xlu1 %v1330_v11, %s1239_s25 }
 0x302   :  { %500 = vrot.lane.b32.xlu1 %v1330_v11, %s1240_s26 }
 0x306   :  { %498 = vrot.lane.b32.xlu1 %v1330_v11, %s1241_s27 }
 0x36e   :  { %v200_v36 = vpop.xlane.xlu1 %199 }
 0x36f   :  { %1172 = vrcp.f32 %v200_v36 }
 0x372   :  { %v203_v37 = vpop.xlane.xlu1 %202 }
 0x373   :  { %1174 = vrcp.f32 %v203_v37 }
 0x376   :  { %v259_v40 = vpop.permute.xlu1 %258 }
 0x377   :  { %v264_v44 = vsel %vm137_vm2, %v259_v40, 0 }
 0x379   :  { %v1173_v38 = vpop.eup %1172 }
 0x37a   :  { %v206_v41 = vmul.f32 %v1173_v38, %v1169_v32  ;;  %v257_v45 = vpop.permute.xlu1 %256 }
 0x37d   :  { %v1175_v39 = vpop.eup %1174 }
 0x37e   :  { %v207_v42 = vmul.f32 %v1175_v39, %v1171_v34  ;;  %v378_v47 = vpop.permute.xlu1 %377 }
 0x380   :  { %v208_v43 = vpack.c.bf16 %v207_v42, %v206_v41 }
 0x382   :  { %1053 = vmatmul.mubr.msk.bf16.vlgmr.msra.gmra.mrb[4].mxu1 %vm185_vm3, %v208_v43  ;;  %v501_v49 = vpop.permute.xlu1 %500 }
 0x383   :  { %1057 = vmatpush3.bf16.xpose.msra.mxu1 %v264_v44  ;;  %1058 = vmatprep.mubr.msk.bf16.mxu1 %vm1233_vm0, %v1232_v1  ;;  %v506_v50 = vsel %vm137_vm2, %v501_v49, 0 }
 0x384   :  { %1068 = vmatprep.subr.bf16.mxu1 %v1232_v1 }
 0x386   :  { %v499_v51 = vpop.permute.xlu1 %498 }
 0x38a   :  { %1059 = vmatmul.mubr.msk.bf16.vlgmr.msra.gmra.mrb[8].mxu1 %vm137_vm2, %v257_v45 }
 0x38b   :  { %1069 = vmatpush3.bf16.xpose.msra.mxu1 %v385_v48  ;;  %1070 = vmatprep.mubr.msk.bf16.mxu1 %vm1233_vm0, %v1232_v1 }
 0x38c   :  { %1080 = vmatprep.subr.bf16.mxu1 %v1232_v1 }
 0x392   :  { %1071 = vmatmul.mubr.msk.bf16.vlgmr.msra.gmra.mrb[12].mxu1 %vm137_vm2, %v378_v47 }
 0x393   :  { %1081 = vmatpush3.bf16.xpose.msra.mxu1 %v506_v50  ;;  %1082 = vmatprep.mubr.msk.bf16.mxu1 %vm1233_vm0, %v1232_v1 }
 0x394   :  { %1092 = vmatprep.subr.bf16.mxu1 %v1232_v1 }
 0x39a   :  { %1083 = vmatmul.mubr.msk.bf16.vlgmr.msra.gmra.mrb[16].mxu1 %vm137_vm2, %v499_v51 }
 0x39b   :  { %1096 = vmatprep.mubr.msk.bf16.mxu1 %vm1233_vm0, %v1232_v1 }
 0x455   :  { %v1381_v52 = vpop.f32.mrb[4].mxu1 }
 0x456   :  { %v1054_v53 = vpop.f32.mrb[5].mxu1 }
 0x457   :  { %v1383_v54 = vpop.f32.mrb[6].mxu1 }
 0x458   :  { %v1055_v55 = vpop.f32.mrb[7].mxu1 }
 0x45d   :  { %v300_v56 = vpop.f32.mrb[8].mxu1 }
 0x45e   :  { %v301_v57 = vadd.f32 %v300_v56, %v1342_v15  ;;  %v1060_v58 = vpop.f32.mrb[9].mxu1 }
 0x45f   :  { %v303_v59 = vpop.f32.mrb[10].mxu1 }
 0x460   :  { %v304_v60 = vadd.f32 %v303_v59, %v1347_v17  ;;  %v1061_v61 = vpop.f32.mrb[11].mxu1  ;;  %v307_v62 = vsel %vm185_vm3, %v301_v57, -inf }
 0x461   :  { %308 = vmax.xlane.f32.xlu1 %v307_v62 }
 0x462   :  { %v310_v63 = vsel %vm185_vm3, %v304_v60, -inf }
 0x463   :  { %311 = vmax.xlane.f32.xlu0 %v310_v63 }
 0x465   :  { %v421_v0 = vpop.f32.mrb[12].mxu1 }
 0x466   :  { %v422_v2 = vadd.f32 %v421_v0, %v1342_v15  ;;  %v1072_v3 = vpop.f32.mrb[13].mxu1 }
 0x467   :  { %v424_v4 = vpop.f32.mrb[14].mxu1 }
 0x468   :  { %v425_v5 = vadd.f32 %v424_v4, %v1347_v17  ;;  %v1073_v6 = vpop.f32.mrb[15].mxu1  ;;  %v428_v7 = vsel %vm185_vm3, %v422_v2, -inf }
 0x469   :  { %429 = vmax.xlane.f32.xlu1 %v428_v7 }
 0x46a   :  { %v431_v8 = vsel %vm185_vm3, %v425_v5, -inf }
 0x46b   :  { %432 = vmax.xlane.f32.xlu0 %v431_v8 }
 0x46d   :  { %v542_v9 = vpop.f32.mrb[16].mxu1 }
 0x46e   :  { %v543_v10 = vadd.f32 %v542_v9, %v1342_v15  ;;  %v1084_v12 = vpop.f32.mrb[17].mxu1 }
 0x46f   :  { %v545_v13 = vpop.f32.mrb[18].mxu1 }
 0x470   :  { %v546_v14 = vadd.f32 %v545_v13, %v1347_v17  ;;  %v1085_v16 = vpop.f32.mrb[19].mxu1  ;;  %v549_v18 = vsel %vm185_vm3, %v543_v10, -inf }
 0x471   :  { %550 = vmax.xlane.f32.xlu1 %v549_v18 }
 0x472   :  { %v552_v19 = vsel %vm185_vm3, %v546_v14, -inf }
 0x473   :  { %553 = vmax.xlane.f32.xlu0 %v552_v19 }
 0x482   :  { %330 = vrot.lane.b32.xlu1 %v1330_v11, %s1242_s28 }
 0x4ee   :  { %v309_v20 = vpop.xlane.xlu1 %308 }
 0x4ef   :  { %v313_v21 = vsub.f32 %v301_v57, %v309_v20 }
 0x4f0   :  { %v312_v22 = vpop.xlane.xlu0 %311 }
 0x4f1   :  { %v315_v23 = vmul.f32 1.442695, %v313_v21  ;;  %v314_v24 = vsub.f32 %v304_v60, %v312_v22  ;;  %v1161_v21 = vld [vmem:[%s1513_s4 + $0x8] sm:$0xff]  }
 0x4f3   :  { %1176 = vpow2.f32 %v315_v23  ;;  %v317_v15 = vmul.f32 1.442695, %v314_v24 }
 0x4f5   :  { %1178 = vpow2.f32 %v317_v15 }
 0x4f6   :  { %v430_v25 = vpop.xlane.xlu1 %429 }
 0x4f7   :  { %v434_v17 = vsub.f32 %v422_v2, %v430_v25 }
 0x4f8   :  { %v433_v26 = vpop.xlane.xlu0 %432 }
 0x4f9   :  { %v436_v27 = vmul.f32 1.442695, %v434_v17  ;;  %v435_v28 = vsub.f32 %v425_v5, %v433_v26 }
 0x4fb   :  { %1180 = vpow2.f32 %v436_v27  ;;  %v438_v29 = vmul.f32 1.442695, %v435_v28 }
 0x4fd   :  { %v1177_v30 = vpop.eup %1176  ;;  %1182 = vpow2.f32 %v438_v29 }
 0x4fe   :  { %v551_v31 = vpop.xlane.xlu1 %550  ;;  %v319_v32 = vsel %vm185_vm3, %v1177_v30, 0.0 }
 0x4ff   :  { %v1179_v33 = vpop.eup %1178  ;;  %v555_v34 = vsub.f32 %v543_v10, %v551_v31  ;;  %320 = vadd.xlane.f32.xlu1 %v319_v32 }
 0x500   :  { %v554_v35 = vpop.xlane.xlu0 %553  ;;  %v322_v36 = vsel %vm185_vm3, %v1179_v33, 0.0 }
 0x501   :  { %v557_v37 = vmul.f32 1.442695, %v555_v34  ;;  %v556_v38 = vsub.f32 %v546_v14, %v554_v35  ;;  %323 = vadd.xlane.f32.xlu0 %v322_v36  ;;  %v1160_v14 = vld [vmem:[%s1513_s4] sm:$0xff]  }
 0x502   :  { %v331_v39 = vpop.permute.xlu1 %330  ;;  %1093 = vmatpush3.bf16.msra.mxu1 %v1160_v14 }
 0x503   :  { %1184 = vpow2.f32 %v557_v37  ;;  %v559_v40 = vmul.f32 1.442695, %v556_v38  ;;  %1063 = vmatpush3.bf16.msra.mxu0 %v331_v39  ;;  %1094 = vmatprep.subr.bf16.mxu1 %v1232_v1 }
 0x504   :  { %1074 = vmatprep.subr.bf16.mxu0 %v1232_v1 }
 0x505   :  { %v1181_v41 = vpop.eup %1180  ;;  %1186 = vpow2.f32 %v559_v40 }
 0x506   :  { %v440_v42 = vsel %vm185_vm3, %v1181_v41, 0.0  ;;  %1095 = vmatpush3.bf16.msra.mxu1 %v1161_v21 }
 0x507   :  { %v1183_v43 = vpop.eup %1182  ;;  %441 = vadd.xlane.f32.xlu1 %v440_v42  ;;  %1108 = vmatprep.subr.bf16.mxu1 %v1232_v1 }
 0x508   :  { %v443_v44 = vsel %vm185_vm3, %v1183_v43, 0.0 }
 0x509   :  { %444 = vadd.xlane.f32.xlu0 %v443_v44  ;;  %v656_v44 = vlaneseq }
 0x50d   :  { %v1185_v45 = vpop.eup %1184 }
 0x50e   :  { %v561_v46 = vsel %vm185_vm3, %v1185_v45, 0.0 }
 0x50f   :  { %v1187_v47 = vpop.eup %1186  ;;  %562 = vadd.xlane.f32.xlu1 %v561_v46 }
 0x510   :  { %v564_v48 = vsel %vm185_vm3, %v1187_v47, 0.0 }
 0x511   :  { %565 = vadd.xlane.f32.xlu0 %v564_v48  ;;  %v717_v48 = vld [vmem:[%s1510_s1] sm:$0xff] }
 0x520   :  { %572 = vrot.lane.b32.xlu1 %v1330_v11, %s1243_s29 }
 0x527   :  { %451 = vrot.lane.b32.xlu0 %v1330_v11, %s1244_s30 }
 0x58c   :  { %v321_v49 = vpop.xlane.xlu1 %320 }
 0x58d   :  { %1188 = vrcp.f32 %v321_v49 }
 0x58e   :  { %v324_v50 = vpop.xlane.xlu0 %323 }
 0x58f   :  { %1190 = vrcp.f32 %v324_v50 }
 0x594   :  { %v442_v51 = vpop.xlane.xlu1 %441 }
 0x595   :  { %1192 = vrcp.f32 %v442_v51 }
 0x596   :  { %v445_v53 = vpop.xlane.xlu0 %444 }
 0x597   :  { %v1189_v55 = vpop.eup %1188  ;;  %1194 = vrcp.f32 %v445_v53  ;;  %v718_v53 = vld [vmem:[%s1510_s1 + $0x8] sm:$0xff] }
 0x598   :  { %v327_v57 = vmul.f32 %v1189_v55, %v1177_v30 }
 0x599   :  { %v1191_v56 = vpop.eup %1190 }
 0x59a   :  { %v328_v58 = vmul.f32 %v1191_v56, %v1179_v33 }
 0x59c   :  { %v563_v59 = vpop.xlane.xlu1 %562  ;;  %v329_v60 = vpack.c.bf16 %v328_v58, %v327_v57 }
 0x59d   :  { %1196 = vrcp.f32 %v563_v59 }
 0x59e   :  { %1065 = vmatmul.mubr.msk.bf16.vlgmr.msra.gmra.mrb[4].mxu0 %vm185_vm3, %v329_v60  ;;  %v566_v61 = vpop.xlane.xlu0 %565 }
 0x59f   :  { %v1193_v62 = vpop.eup %1192  ;;  %1198 = vrcp.f32 %v566_v61  ;;  %1076 = vmatprep.mubr.msk.bf16.mxu0 %vm1233_vm0, %v1232_v1 }
 0x5a0   :  { %v448_v63 = vmul.f32 %v1193_v62, %v1181_v41  ;;  %v573_v4 = vpop.permute.xlu1 %572 }
 0x5a1   :  { %v1195_v11 = vpop.eup %1194 }
 0x5a2   :  { %v449_v0 = vmul.f32 %v1195_v11, %v1183_v43  ;;  %v452_v2 = vpop.permute.xlu0 %451 }
 0x5a3   :  { %1075 = vmatpush3.bf16.msra.mxu0 %v452_v2 }
 0x5a4   :  { %v450_v3 = vpack.c.bf16 %v449_v0, %v448_v63  ;;  %1086 = vmatprep.subr.bf16.mxu0 %v1232_v1 }
 0x5a6   :  { %1077 = vmatmul.mubr.msk.bf16.vlgmr.msra.gmra.mrb[8].mxu0 %vm185_vm3, %v450_v3 }
 0x5a7   :  { %v1197_v5 = vpop.eup %1196  ;;  %1087 = vmatpush3.bf16.msra.mxu0 %v573_v4  ;;  %1088 = vmatprep.mubr.msk.bf16.mxu0 %vm1233_vm0, %v1232_v1 }
 0x5a8   :  { %1100 = vmatprep.subr.bf16.mxu0 %v1232_v1  ;;  %v569_v7 = vmul.f32 %v1197_v5, %v1185_v45  ;;  %v1442_v45 = vld [vmem:[%s1516_s7] sm:$0xff] }
 0x5a9   :  { %v1199_v6 = vpop.eup %1198 }
 0x5aa   :  { %v570_v8 = vmul.f32 %v1199_v6, %v1187_v47 }
 0x5ac   :  { %v571_v9 = vpack.c.bf16 %v570_v8, %v569_v7  ;;  %v1162_v7 = vld [vmem:[%s1514_s5] sm:$0xff]   ;;  %v1163_v8 = vld [vmem:[%s1514_s5 + $0x8] sm:$0xff]  }
 0x5ae   :  { %1089 = vmatmul.mubr.msk.bf16.vlgmr.msra.gmra.mrb[12].mxu0 %vm185_vm3, %v571_v9  ;;  %v1164_v9 = vld [vmem:[%s1515_s6] sm:$0xff]  }
 0x5af   :  { %1104 = vmatprep.mubr.msk.bf16.mxu0 %vm1233_vm0, %v1232_v1  ;;  %1101 = vmatpush3.bf16.msra.mxu0 %v1162_v7 }
 0x5b0   :  { %1102 = vmatprep.subr.bf16.mxu0 %v1232_v1 }
 0x5b3   :  { %1103 = vmatpush3.bf16.msra.mxu0 %v1163_v8 }
 0x671   :  { %v370_v10 = vpop.f32.mrb[4].mxu0 }
 0x672   :  { %v1066_v12 = vpop.f32.mrb[5].mxu0 }
 0x673   :  { %v373_v13 = vpop.f32.mrb[6].mxu0 }
 0x674   :  { %v1138_v16 = vpack.i.bf16 %v373_v13, %v370_v10  ;;  %v1067_v18 = vpop.f32.mrb[7].mxu0  ;;  %v1165_v10 = vld [vmem:[%s1515_s6 + $0x8] sm:$0xff]  }
 0x676   :  { %1139 = vrot.lane.b32.xlu1 %v1138_v16, %s1245_s11 }
 0x679   :  { %v491_v19 = vpop.f32.mrb[8].mxu0 }
 0x67a   :  { %v1078_v20 = vpop.f32.mrb[9].mxu0 }
 0x67b   :  { %v494_v22 = vpop.f32.mrb[10].mxu0 }
 0x67c   :  { %v1143_v23 = vpack.i.bf16 %v494_v22, %v491_v19  ;;  %v1079_v24 = vpop.f32.mrb[11].mxu0 }
 0x67e   :  { %1144 = vrot.lane.b32.xlu0 %v1143_v23, %s1246_s14 }
 0x681   :  { %v612_v15 = vpop.f32.mrb[12].mxu0 }
 0x682   :  { %v1090_v25 = vpop.f32.mrb[13].mxu0 }
 0x683   :  { %v615_v17 = vpop.f32.mrb[14].mxu0 }
 0x684   :  { %v1148_v26 = vpack.i.bf16 %v615_v17, %v612_v15  ;;  %v1091_v27 = vpop.f32.mrb[15].mxu0 }
 0x686   :  { %1149 = vrot.lane.b32.xlu1 %v1148_v26, %s1247_s15 }
 0x6e8   :  { %v1140_v28 = vpop.permute.xlu1 %1139 }
 0x6e9   :  { %v1142_v30 = vunpack.i.h.bf16 %v1140_v28  ;;  %v1141_v31 = vunpack.i.l.bf16 %v1140_v28 }
 0x6eb   :  { %v644_v35 = vsel %vm137_vm2, %v1383_v54, %v1142_v30  ;;  %v643_v36 = vsel %vm137_vm2, %v1381_v52, %v1141_v31  ;;  %v1436_v54 = vshrl.u32 %v656_v44, 7  ;;  %v1166_v31 = vld [vmem:[%s1515_s6 + $0x10] sm:$0xff]  }
 0x6ed   :  { %v658_v52 = vsub.s32 0, %v1436_v54  ;;  %v750_v20 = vsub.s32 3, %v1436_v54  ;;  %v756_v24 = vsub.s32 4, %v1436_v54 }
 0x6ef   :  { %v659_v46 = vrot.slane %v1442_v45, %v658_v52  ;;  %v751_v22 = vrot.slane %v1442_v45, %v750_v20  ;;  %v757_v26 = vrot.slane %v1442_v45, %v756_v24 }
 0x6f0   :  { %v1145_v29 = vpop.permute.xlu0 %1144 }
 0x6f1   :  { %v1147_v32 = vunpack.i.h.bf16 %v1145_v29  ;;  %v1146_v33 = vunpack.i.l.bf16 %v1145_v29 }
 0x6f3   :  { %v646_v39 = vsel %vm185_vm3, %v644_v35, %v1147_v32  ;;  %v645_v40 = vsel %vm185_vm3, %v643_v36, %v1146_v33  ;;  %v1167_v32 = vld [vmem:[%s1515_s6 + $0x18] sm:$0xff]   ;;  %v767_v33 = vsub.s32 1, %v1436_v54  ;;  %s1248_s6 = smov [#allocation2]  }
 0x6f4   :  { %s956_s27 = sshll.u32 %s1248_s6, 4  ;;  %s957_s27 = int_to_ptr.vmem [resolvable:$true] %s956_s27 }
 0x6f5   :  { %s1208_s28 = scalar_lea.vmem %s957_s27, 256  ;;  %p1213_p1 = scmp.lt.s32.totalorder %s957_s27, %s957_s27 }
 0x6f6   :  { %p1209_p0 = scmp.ne.s32.totalorder %s957_s27, %s1208_s28  ;;  %p1214_p2 = scmp.lt.s32.totalorder %s1208_s28, %s1208_s28 }
 0x6f8   :  { %v1150_v34 = vpop.permute.xlu1 %1149  ;;  %p1215_p3 = por %p1214_p2, %p1213_p1 }
 0x6f9   :  { %v1152_v37 = vunpack.i.h.bf16 %v1150_v34  ;;  %v1151_v38 = vunpack.i.l.bf16 %v1150_v34  ;;  %v768_v34 = vrot.slane %v1442_v45, %v767_v33 }
 0x6fa   :  { %p1216_p4 = pnand %p1215_p3, %p1209_p0 }
 0x6fb   :  { %v649_v41 = vsel %vm647_vm4, %v646_v39, %v1152_v37  ;;  %v648_v42 = vsel %vm647_vm4, %v645_v40, %v1151_v38 }
 0x6fc   :  { %v650_v43 = vpack.c.bf16 %v649_v41, %v648_v42 }
 0x6fe   :  { %1097 = vmatmul.mubr.msk.bf16.vlgmr.msra.gmra.mrb[20].mxu1 %vm672_vm5, %v650_v43 }
 0x6ff   :  { %1116 = vmatprep.mubr.msk.bf16.mxu1 %vm1233_vm0, %v1232_v1  ;;  %1109 = vmatpush3.bf16.msra.mxu1 %v1164_v9  ;;  %v939_v9 = vsub.s32 5, %v1436_v54 }
 0x700   :  { %1110 = vmatprep.subr.bf16.mxu1 %v1232_v1 }
 0x703   :  { %1111 = vmatpush3.bf16.msra.mxu1 %v1165_v10  ;;  %v945_v10 = vsub.s32 6, %v1436_v54 }
 0x704   :  { %1112 = vmatprep.subr.bf16.mxu1 %v1232_v1 }
 0x707   :  { %1113 = vmatpush3.bf16.msra.mxu1 %v1166_v31 }
 0x708   :  { %1114 = vmatprep.subr.bf16.mxu1 %v1232_v1  ;;  %v838_v1 = vsub.s32 2, %v1436_v54 }
 0x70a   :  { %v839_v44 = vrot.slane %v1442_v45, %v838_v1 }
 0x70b   :  { %1115 = vmatpush3.bf16.msra.mxu1 %v1167_v32 }
 0x7d1   :  { %v710_v47 = vpop.f32.mrb[20].mxu1 }
 0x7d2   :  { %v711_v49 = vadd.f32 %v710_v47, %v659_v46  ;;  %v1098_v50 = vpop.f32.mrb[21].mxu1 }
 0x7d3   :  { %v713_v51 = vpop.f32.mrb[22].mxu1 }
 0x7d4   :  { %v714_v55 = vadd.f32 %v713_v51, %v659_v46  ;;  %v1099_v56 = vpop.f32.mrb[23].mxu1  ;;  %v719_v57 = vadd.f32 %v717_v48, %v711_v49 }
 0x7d6   :  { %v721_v58 = vsel %vm672_vm5, %v719_v57, 0.0  ;;  %v720_v59 = vadd.f32 %v718_v53, %v714_v55 }
 0x7d7   :  { %722 = vadd.xlane.f32.xlu0 %v721_v58 }
 0x7d8   :  { %v724_v60 = vsel %vm672_vm5, %v720_v59, 0.0 }
 0x7d9   :  { %725 = vadd.xlane.f32.xlu1 %v724_v60 }
 0x864   :  { %v723_v61 = vpop.xlane.xlu0 %722 }
 0x865   :  { %v728_v62 = vmul.f32 0.03125, %v723_v61 }
 0x866   :  { %v726_v11 = vpop.xlane.xlu1 %725 }
 0x867   :  { %v730_v63 = vsub.f32 %v719_v57, %v728_v62  ;;  %v729_v0 = vmul.f32 0.03125, %v726_v11 }
 0x869   :  { %v731_v2 = vsub.f32 %v720_v59, %v729_v0  ;;  %v732_v3 = vmul.f32 %v730_v63, %v730_v63 }
 0x86b   :  { %v734_v4 = vsel %vm672_vm5, %v732_v3, 0.0  ;;  %v733_v5 = vmul.f32 %v731_v2, %v731_v2 }
 0x86c   :  { %735 = vadd.xlane.f32.xlu0 %v734_v4 }
 0x86d   :  { %v737_v6 = vsel %vm672_vm5, %v733_v5, 0.0 }
 0x870   :  { %738 = vadd.xlane.f32.xlu0 %v737_v6 }
 0x8f9   :  { %v736_v12 = vpop.xlane.xlu0 %735 }
 0x8fa   :  { %v740_v13 = vmul.f32 0.03125, %v736_v12  ;;  %v940_v12 = vrot.slane %v1442_v45, %v939_v9 }
 0x8fc   :  { %v742_v14 = vadd.f32 1e-05, %v740_v13 }
 0x8fd   :  { %v739_v16 = vpop.xlane.xlu0 %738 }
 0x8fe   :  { %1200 = vrsqrt.f32 %v742_v14  ;;  %v741_v18 = vmul.f32 0.03125, %v739_v16  ;;  %v946_v16 = vrot.slane %v1442_v45, %v945_v10 }
 0x900   :  { %v743_v19 = vadd.f32 1e-05, %v741_v18 }
 0x902   :  { %1202 = vrsqrt.f32 %v743_v19 }
 0x908   :  { %v1201_v21 = vpop.eup %1200 }
 0x909   :  { %v746_v23 = vmul.f32 %v1201_v21, %v730_v63 }
 0x90b   :  { %v752_v25 = vmul.f32 %v751_v22, %v746_v23 }
 0x90c   :  { %v1203_v15 = vpop.eup %1202 }
 0x90d   :  { %v747_v17 = vmul.f32 %v1203_v15, %v731_v2  ;;  %v758_v28 = vadd.f32 %v757_v26, %v752_v25 }
 0x90f   :  { %v753_v27 = vmul.f32 %v751_v22, %v747_v17 }
 0x911   :  { %v759_v29 = vadd.f32 %v757_v26, %v753_v27 }
 0x913   :  { %v760_v30 = vpack.c.bf16 %v759_v29, %v758_v28 }
 0x915   :  { %1105 = vmatmul.mubr.msk.bf16.vlgmr.msra.gmra.mrb[16].mxu0 %vm672_vm5, %v760_v30 }
 0x9e8   :  { %v818_v35 = vpop.f32.mrb[16].mxu0 }
 0x9e9   :  { %v819_v36 = vadd.f32 %v818_v35, %v768_v34  ;;  %v1106_v37 = vpop.f32.mrb[17].mxu0 }
 0x9ea   :  { %v821_v38 = vpop.f32.mrb[18].mxu0 }
 0x9eb   :  { %v822_v39 = vadd.f32 %v821_v38, %v768_v34  ;;  %v1107_v40 = vpop.f32.mrb[19].mxu0  ;;  %v825_v41 = vmax.f32 %v819_v36, 0.0 }
 0x9ed   :  { %v826_v42 = vmax.f32 %v822_v39, 0.0 }
 0x9ef   :  { %v827_v43 = vpack.c.bf16 %v826_v42, %v825_v41 }
 0x9f1   :  { %1117 = vmatmul.mubr.msk.bf16.vlgmr.msra.gmra.mrb[24].mxu1 %vm864_vm6, %v827_v43 }
 0xac4   :  { %v902_v52 = vpop.f32.mrb[24].mxu1 }
 0xac5   :  { %v903_v46 = vadd.f32 %v902_v52, %v839_v44  ;;  %v1118_v47 = vpop.f32.mrb[25].mxu1 }
 0xac6   :  { %v905_v48 = vpop.f32.mrb[26].mxu1 }
 0xac7   :  { %v906_v49 = vadd.f32 %v905_v48, %v839_v44  ;;  %v1119_v50 = vpop.f32.mrb[27].mxu1  ;;  %v909_v51 = vadd.f32 %v903_v46, %v758_v28 }
 0xac9   :  { %v911_v53 = vsel %vm672_vm5, %v909_v51, 0.0  ;;  %v910_v55 = vadd.f32 %v906_v49, %v759_v29 }
 0xaca   :  { %912 = vadd.xlane.f32.xlu1 %v911_v53 }
 0xacb   :  { %v914_v56 = vsel %vm672_vm5, %v910_v55, 0.0 }
 0xacc   :  { %915 = vadd.xlane.f32.xlu0 %v914_v56 }
 0xb57   :  { %v913_v57 = vpop.xlane.xlu1 %912 }
 0xb58   :  { %v917_v58 = vmul.f32 0.03125, %v913_v57 }
 0xb59   :  { %v916_v59 = vpop.xlane.xlu0 %915 }
 0xb5a   :  { %v919_v60 = vsub.f32 %v909_v51, %v917_v58  ;;  %v918_v61 = vmul.f32 0.03125, %v916_v59 }
 0xb5c   :  { %v920_v62 = vsub.f32 %v910_v55, %v918_v61  ;;  %v921_v11 = vmul.f32 %v919_v60, %v919_v60 }
 0xb5e   :  { %v923_v63 = vsel %vm672_vm5, %v921_v11, 0.0  ;;  %v922_v0 = vmul.f32 %v920_v62, %v920_v62 }
 0xb5f   :  { %924 = vadd.xlane.f32.xlu1 %v923_v63 }
 0xb60   :  { %v926_v2 = vsel %vm672_vm5, %v922_v0, 0.0 }
 0xb61   :  { %927 = vadd.xlane.f32.xlu0 %v926_v2 }
 0xbec   :  { %v925_v3 = vpop.xlane.xlu1 %924 }
 0xbed   :  { %v929_v4 = vmul.f32 0.03125, %v925_v3 }
 0xbee   :  { %v928_v5 = vpop.xlane.xlu0 %927 }
 0xbef   :  { %v931_v6 = vadd.f32 1e-05, %v929_v4  ;;  %v930_v7 = vmul.f32 0.03125, %v928_v5 }
 0xbf1   :  { %1204 = vrsqrt.f32 %v931_v6  ;;  %v932_v8 = vadd.f32 1e-05, %v930_v7 }
 0xbf3   :  { %1206 = vrsqrt.f32 %v932_v8 }
 0xbfb   :  { %v1205_v13 = vpop.eup %1204 }
 0xbfc   :  { %v935_v14 = vmul.f32 %v1205_v13, %v919_v60 }
 0xbfd   :  { %v1207_v18 = vpop.eup %1206 }
 0xbfe   :  { %v936_v19 = vmul.f32 %v1207_v18, %v920_v62  ;;  %v941_v20 = vmul.f32 %v940_v12, %v935_v14 }
 0xc00   :  { %v942_v21 = vmul.f32 %v940_v12, %v936_v19  ;;  %v947_v22 = vadd.f32 %v946_v16, %v941_v20 }
 0xc02   :  { %v948_v23 = vadd.f32 %v946_v16, %v942_v21  ;;  %949 = vst.msk [vmem:[#allocation2] sm:$0xff] %vm672_vm5, %v947_v22 }
 0xc04   :  { %950 = vst.msk [vmem:[#allocation2 + $0x8] sm:$0xff] %vm672_vm5, %v948_v23 }
 0xc05   :  { %1219 = shalt.err (!%p1216_p4)
}
 0xc06   :  { %s1220_s9 = scalar_lea.hbm %s1517_s8, 256 }
 0xc07   :  { %p1221_p5 = scmp.ne.s32.totalorder %s1517_s8, %s1220_s9  ;;  %p1224_p6 = scmp.lt.u32.totalorder %s1220_s9, %s1517_s8 }
 0xc09   :  { %p1226_p7 = pnand %p1224_p6, %p1221_p5 }
 0xc0b   :  { %1229 = shalt.err (!%p1226_p7)
}
 0xc0c   :  { %s1249_s15 = smov 128  }
 0xc0d   :  { %962 = dma.vmem_to_hbm [thread:$0]  %s957_s27, 256, %s1517_s8, [#allocation3], %s1249_s15, %s1249_s15, %s1245_s11  }
 0xc0e   :  { %1230 = dma.done.wait [#allocation3], 256  }
 0xc0f   :  { %1231 = vsyncadd [#allocation3], 4294967040 }
 0xc10   :  { %966 = vsyncpa [#allocation3], 1 }

</bundles_post_ra>
